<compile_context>
chip_gen: v6e
topology: v6e:2x2x1
jax: 0.10.0
libtpu: 0.0.40
codegen_flags: <defaults>
</compile_context>

<pallas_src>
import jax
import jax.numpy as jnp
from jax.experimental import pallas as pl
from jax.experimental.pallas import tpu as pltpu


def linear_kernel(params_ref, x_ref, o_ref):
    # params_ref: SMEM (3,) f32 = [w00, w01, b0]
    # x_ref:      VMEM (2, TB)   lane-dense input tile
    # o_ref:      VMEM (1, TB)   lane-dense output tile
    w0 = params_ref[0]
    w1 = params_ref[1]
    b = params_ref[2]
    y = w0 * x_ref[0:1, :] + w1 * x_ref[1:2, :] + b   # VPU only, no MXU/XLU
    o_ref[...] = y.astype(o_ref.dtype)


def linear_forward(x, weight, bias, *, tb=1024):
    """x: (B, 2) f32, weight: (1, 2) f32, bias: (1,) f32 -> (B, 1) f32."""
    B, in_f = x.shape
    out_f, _ = weight.shape

    # Tile size: multiple of 128 lanes, clamped so small batches use one tile.
    lane = 128
    b_lane = pl.cdiv(B, lane) * lane
    tb = max(lane, min(tb, b_lane))
    B_pad = pl.cdiv(B, tb) * tb

    # Lane-dense layout: (in_f, B); pad batch up to a multiple of the tile.
    xt = x.T                                   # (2, B) -- wrapper-side, free
    if B_pad != B:
        xt = jnp.pad(xt, ((0, 0), (0, B_pad - B)))

    # Fold weight + bias into a tiny SMEM scalar vector: [w00, w01, b0].
    params = jnp.concatenate(
        [weight.reshape(-1), bias.reshape(-1)]).astype(jnp.float32)

    grid = (B_pad // tb,)
    out = pl.pallas_call(
        linear_kernel,
        out_shape=jax.ShapeDtypeStruct((out_f, B_pad), x.dtype),
        grid=grid,
        in_specs=[
            pl.BlockSpec(memory_space=pltpu.MemorySpace.SMEM),   # params (3,)
            pl.BlockSpec((in_f, tb), lambda i: (0, i)),          # x tile (2,TB)
        ],
        out_specs=pl.BlockSpec((out_f, tb), lambda i: (0, i)),   # out (1,TB)
        compiler_params=pltpu.CompilerParams(
            dimension_semantics=("parallel",)),
    )(params, xt)

    return out[:, :B].T                        # back to PyTorch layout (B, 1)


if __name__ == "__main__":
    key = jax.random.PRNGKey(0)
    kx, kw, kb = jax.random.split(key, 3)

    B, IN, OUT = 8, 2, 1
    x = jax.random.normal(kx, (B, IN), dtype=jnp.float32)

    # nn.Linear default init: uniform(-1/sqrt(in), 1/sqrt(in))
    bound = 1.0 / jnp.sqrt(jnp.float32(IN))
    weight = jax.random.uniform(kw, (OUT, IN), minval=-bound, maxval=bound,
                                dtype=jnp.float32)
    bias = jax.random.uniform(kb, (OUT,), minval=-bound, maxval=bound,
                              dtype=jnp.float32)

    out = linear_forward(x, weight, bias)
    out = jax.block_until_ready(out)

    # Reference: plain-JAX nn.Linear forward
    ref = x @ weight.T + bias
    assert out.shape == (B, OUT)
    assert jnp.allclose(out, ref, atol=1e-5, rtol=1e-5)

    print("KERNEL_OK")
</pallas_src>

<mosaic_0001>
module attributes {stable_mosaic.version = 11 : i64} {
  func.func @linear_kernel(%arg0: i32, %arg1: memref<3xf32, #tpu.memory_space<smem>>, %arg2: memref<2x128xf32, #tpu.memory_space<vmem>>, %arg3: memref<1x128xf32, #tpu.memory_space<vmem>>) attributes {dimension_semantics = [#tpu.dimension_semantics<parallel>], iteration_bounds = array<i64: 1>, scalar_prefetch = 0 : i64, scratch_operands = 0 : i64, tpu.core_type = #tpu.core_type<tc>, window_params = [{transform_indices = @transform_0, window_bounds = array<i64: 3>}, {transform_indices = @transform_1, window_bounds = array<i64: 2, 128>}, {transform_indices = @transform_2, window_bounds = array<i64: 1, 128>}]} {
    %c0 = arith.constant 0 : index
    %0 = memref.load %arg1[%c0] : memref<3xf32, #tpu.memory_space<smem>>
    %c1 = arith.constant 1 : index
    %1 = memref.load %arg1[%c1] : memref<3xf32, #tpu.memory_space<smem>>
    %c2 = arith.constant 2 : index
    %2 = memref.load %arg1[%c2] : memref<3xf32, #tpu.memory_space<smem>>
    %c0_0 = arith.constant 0 : index
    %c0_1 = arith.constant 0 : index
    %3 = vector.load %arg2[%c0_0, %c0_1] : memref<2x128xf32, #tpu.memory_space<vmem>>, vector<1x128xf32>
    %4 = vector.broadcast %0 : f32 to vector<1x128xf32>
    %5 = arith.mulf %4, %3 : vector<1x128xf32>
    %c1_2 = arith.constant 1 : index
    %c0_3 = arith.constant 0 : index
    %6 = vector.load %arg2[%c1_2, %c0_3] : memref<2x128xf32, #tpu.memory_space<vmem>>, vector<1x128xf32>
    %7 = vector.broadcast %1 : f32 to vector<1x128xf32>
    %8 = arith.mulf %7, %6 : vector<1x128xf32>
    %9 = arith.addf %5, %8 : vector<1x128xf32>
    %10 = vector.broadcast %2 : f32 to vector<1x128xf32>
    %11 = arith.addf %9, %10 : vector<1x128xf32>
    %c0_4 = arith.constant 0 : index
    %c0_5 = arith.constant 0 : index
    %12 = vector.load %arg3[%c0_4, %c0_5] : memref<1x128xf32, #tpu.memory_space<vmem>>, vector<1x128xf32>
    tpu.vector_store %arg3[%c0_4, %c0_5], %11 {strides = array<i32>} : memref<1x128xf32, #tpu.memory_space<vmem>>, vector<1x128xf32>,
    return
  }
  func.func @transform_0(%arg0: i32) -> i32 {
    %c0_i32 = arith.constant 0 : i32
    %c0_i32_0 = arith.constant 0 : i32
    return %c0_i32 : i32
  }
  func.func @transform_1(%arg0: i32) -> (i32, i32) {
    %c0_i32 = arith.constant 0 : i32
    %c0_i32_0 = arith.constant 0 : i32
    return %c0_i32, %arg0 : i32, i32
  }
  func.func @transform_2(%arg0: i32) -> (i32, i32) {
    %c0_i32 = arith.constant 0 : i32
    %c0_i32_0 = arith.constant 0 : i32
    return %c0_i32, %arg0 : i32, i32
  }
}

</mosaic_0001>

<bundles_post_ra>
// kernel: tpu_custom_call.1
= control target key start
LH: loop header
LB: loop body
LE: loop exit
PB: predicated region body
PF: predicated region fallthrough
CT: control target
= control target key end

     0   :  { %7 = vsyncpa [#allocation5], 0  ;;  %s150_s0 = inlined_call_operand.hbm [shape: f32[3], index: 0, kind: input, shape index: {}]   ;;  %s151_s1 = inlined_call_operand.hbm [shape: f32[2,128], index: 1, kind: input, shape index: {}]   ;;  %s152_s2 = inlined_call_operand.hbm [shape: f32[1,128], index: 2, kind: output, shape index: {}]  }
   0x1   :  { %8 = vsyncpa [#allocation3], 0 }
   0x2   :  { %9 = vsyncpa [#allocation4], 0  ;;  %s123_s9 = smov [#allocation2]   ;;  %s124_s12 = smov [#allocation6]  }
   0x3   :  { %17 = dma.hbm_to_smem %s150_s0, 16, %s123_s9, [#allocation5]  }
   0x4   :  { %s24_s13 = sshll.u32 %s124_s12, 4  ;;  %s25_s13 = int_to_ptr.vmem [resolvable:$true] %s24_s13 }
   0x5   :  { %s85_s14 = scalar_lea.vmem %s25_s13, 32  ;;  %p90_p1 = scmp.lt.s32.totalorder %s25_s13, %s25_s13 }
   0x6   :  { %p86_p0 = scmp.ne.s32.totalorder %s25_s13, %s85_s14  ;;  %p91_p2 = scmp.lt.s32.totalorder %s85_s14, %s85_s14 }
   0x8   :  { %p92_p3 = por %p91_p2, %p90_p1 }
   0xa   :  { %p93_p4 = pnand %p92_p3, %p86_p0 }
   0xc   :  { %96 = shalt.err (!%p93_p4)
}
   0xd   :  { %27 = dma.hbm_to_vmem [thread:$0]  %s151_s1, 32, %s25_s13, [#allocation3]  }
   0xe   :  { %117 = dma.done.wait [#allocation5], 16  }
   0xf   :  { %118 = vsyncadd [#allocation5], 4294967280 }
  0x10   :  { %119 = dma.done.wait [#allocation3], 32  }
  0x11   :  { %120 = vsyncadd [#allocation3], 4294967264 }
  0x12   :  { %34 = sfence }
  0x13   :  { %s35_s0 = sld [smem:[#allocation2]]  ;;  %v38_v0 = vld [vmem:[#allocation6] sm:$0x1]  ;;  %v41_v1 = vld [vmem:[#allocation6 + $0x1] sm:$0x1]  ;;  %s125_s19 = smov [#allocation7]  }
  0x14   :  { %s64_s17 = sld [smem:[#allocation2 + $0x1]]  ;;  %s54_s20 = sshll.u32 %s125_s19, 4  ;;  %s55_s20 = int_to_ptr.vmem [resolvable:$true] %s54_s20 }
  0x15   :  { %s65_s18 = sld [smem:[#allocation2 + $0x2]]  ;;  %s97_s1 = scalar_lea.vmem %s55_s20, 16 }
  0x16   :  { %p98_p5 = scmp.ne.s32.totalorder %s55_s20, %s97_s1  ;;  %s101_s21 = scalar_lea.vmem %s55_s20, 32 }
  0x17   :  { %p102_p6 = scmp.lt.s32.totalorder %s55_s20, %s55_s20  ;;  %p103_p7 = scmp.lt.s32.totalorder %s101_s21, %s97_s1 }
  0x19   :  { %v39_v2 = vstv %s35_s0  ;;  %p104_p8 = por %p103_p7, %p102_p6 }
  0x1a   :  { %v40_v3 = vmul.f32 %v39_v2, %v38_v0  ;;  %v42_v4 = vstv %s64_s17 }
  0x1b   :  { %v43_v5 = vmul.f32 %v42_v4, %v41_v1  ;;  %v45_v6 = vstv %s65_s18  ;;  %p105_p9 = pnand %p104_p8, %p98_p5 }
  0x1d   :  { %v44_v7 = vadd.f32 %v43_v5, %v40_v3 }
  0x1f   :  { %v46_v8 = vadd.f32 %v45_v6, %v44_v7 }
  0x21   :  { %47 = vst [vmem:[#allocation7] sm:$0x1] %v46_v8 }
  0x22   :  { %108 = shalt.err (!%p105_p9)
}
  0x23   :  { %57 = dma.vmem_to_hbm [thread:$0]  %s55_s20, 16, %s152_s2, [#allocation4]  }
  0x24   :  { %121 = dma.done.wait [#allocation4], 16  }
  0x25   :  { %122 = vsyncadd [#allocation4], 4294967280 }
  0x26   :  { %61 = vsyncpa [#allocation3], 1 }
  0x27   :  { %62 = vsyncpa [#allocation4], 1 }
  0x28   :  { %63 = vsyncpa [#allocation5], 1 }

</bundles_post_ra>
